<compile_context>
chip_gen: v5e
topology: v5e:2x2
jax: 0.10.0
libtpu: 0.0.40
codegen_flags: <defaults>
</compile_context>

<pallas_src>
import functools

import jax
import jax.numpy as jnp
from jax import lax
from jax.experimental import pallas as pl
from jax.experimental.pallas import tpu as pltpu

LANES = 128
SUBLANES = 8
BLOCK_ROWS = 4096   # multiple of 32 -> aligned for f32/bf16/int8 packing


def _tensorcores_per_chip() -> int:
    """TensorCores per chip: 2 on v7x-class parts, 1 on v5e/v6e.

    Deliberately conservative: only the device_kind string is trusted, so a
    1-TC chip can never be handed a CORE_PARALLEL slot axis by mistake.
    """
    try:
        kind = jax.devices()[0].device_kind.lower()
    except Exception:
        return 1
    return 2 if ("v7" in kind or "7x" in kind) else 1


NUM_CORES = _tensorcores_per_chip()


def _pdice_partial_kernel(yp_ref, yt_ref, p_ref, acc_ref, *,
                          valid_rows, block_rows, blocks_per_slot,
                          total_blocks, needs_row_mask):
    """Accumulate per-slot partial sums of [y_true_th, y_pred_th, product].

    acc_ref: (1, 3*SUBLANES, LANES) f32 output block, resident across the inner
    ("arbitrary") grid axis; sublane rows [0:8)=i, [8:16)=j, [16:24)=inter.
    """
    s = pl.program_id(0)
    k = pl.program_id(1)

    @pl.when(k == 0)
    def _init():
        acc_ref[...] = jnp.zeros_like(acc_ref)

    if block_rows % SUBLANES == 0:
        g = block_rows // SUBLANES
        # Fold (block_rows,128) -> (8,128) with pure VPU adds (no per-step
        # cross-lane XLU reduce, no SMEM scalar read-modify-write).
        # TODO(synk): if the bf16 path ever turns VALU-bound, move this fold
        # onto the idle MXU via a ones-matrix jnp.dot.
        def _add(row0, x):
            acc_ref[0, row0:row0 + SUBLANES, :] += jnp.sum(
                x.reshape(g, SUBLANES, LANES), axis=0)
    else:
        # Small single-block case (block_rows == rows < BLOCK_ROWS, not a
        # multiple of 8): one cheap sublane reduce into the group's first row.
        def _add(row0, x):
            acc_ref[0, row0:row0 + 1, :] += jnp.sum(x, axis=0, keepdims=True)

    def _accumulate(mask):
        y_true_th = jnp.where(mask, yt_ref[...].astype(jnp.float32), 0.0)
        y_pred_th = jnp.where(mask, yp_ref[...].astype(jnp.float32), 0.0)
        _add(0, y_true_th)
        _add(SUBLANES, y_pred_th)
        # Both operands are already-masked vregs needed for i/j anyway, so the
        # intersection costs exactly one extra VPU mul per vreg (and stays 0
        # even if undefined pad data were NaN).
        _add(2 * SUBLANES, y_true_th * y_pred_th)

    # Threshold in f32 so bf16/fp16 callers match the f32 reference exactly.
    pmask = p_ref[...].astype(jnp.float32) >= 0.8

    if not needs_row_mask:
        # Every block is fully valid -> steady state never builds the iota.
        _accumulate(pmask)
    else:
        blk = s * blocks_per_slot + k       # logical (unclamped) block index
        is_edge = blk >= total_blocks - 1   # last real block or clamped overhang

        @pl.when(jnp.logical_not(is_edge))
        def _interior():
            _accumulate(pmask)

        @pl.when(is_edge)
        def _edge():
            # Pallas partial-block contents are undefined; the global row-id
            # mask keeps them (and duplicate overhang blocks) out of the sums.
            row_id = blk * block_rows + lax.broadcasted_iota(
                jnp.int32, (block_rows, LANES), 0)
            _accumulate(pmask & (row_id < valid_rows))


def _dice_from_sums(i, j, intersection):
    smooth = 0.0  # matches the PyTorch module: i + j == 0 -> inf/NaN there too
    score = (2.0 * intersection + smooth) / (i + j + smooth)
    return 1.0 - score


def _masked_sums(y_pred, y_true, pmap):
    """Plain-JAX partial sums (used for the <128-elem tail / tiny inputs)."""
    mask = pmap.astype(jnp.float32) >= 0.8
    yt_th = jnp.where(mask, y_true.astype(jnp.float32), 0.0)
    yp_th = jnp.where(mask, y_pred.astype(jnp.float32), 0.0)
    return jnp.sum(yt_th), jnp.sum(yp_th), jnp.sum(yt_th * yp_th)


@functools.partial(jax.jit, static_argnames=("num_cores",))
def pdice_loss(y_pred, y_true, pmap, num_cores=None):
    """Pallas TPU implementation of pdice_loss.forward (batch=True path).

    Inputs may be f32/bf16/fp16; they are streamed in their native dtype and
    accumulated in f32 inside the kernel.
    """
    nc = NUM_CORES if num_cores is None else int(num_cores)

    n = y_pred.size
    rows = n // LANES
    tail = n - rows * LANES

    if rows == 0:
        # Fewer than one 128-lane row: not worth a kernel launch.
        return _dice_from_sums(*_masked_sums(y_pred, y_true, pmap))

    def _main2d(x):
        flat = x.reshape(-1)
        if tail:
            flat = flat[: rows * LANES]
        return flat.reshape(rows, LANES)

    yp2d, yt2d, p2d = _main2d(y_pred), _main2d(y_true), _main2d(pmap)

    block_rows = min(BLOCK_ROWS, rows)     # multiple of 32, or the full dim
    total_blocks = (rows + block_rows - 1) // block_rows
    num_slots = nc if (nc > 1 and total_blocks >= nc) else 1
    blocks_per_slot = (total_blocks + num_slots - 1) // num_slots
    needs_row_mask = (rows % block_rows != 0) or \
                     (num_slots * blocks_per_slot > total_blocks)

    def in_map(s, k):
        return (jnp.minimum(s * blocks_per_slot + k, total_blocks - 1), 0)

    in_block = pl.BlockSpec((block_rows, LANES), in_map)
    # TODO(synk): consider pipeline_mode=pl.Buffered(3) on the input specs if a
    # trace ever shows exposed DMA latency at these block sizes.

    kernel = functools.partial(
        _pdice_partial_kernel,
        valid_rows=rows,
        block_rows=block_rows,
        blocks_per_slot=blocks_per_slot,
        total_blocks=total_blocks,
        needs_row_mask=needs_row_mask,
    )

    if num_slots > 1:
        # Real core split on multi-TC chips (v7x); plain "parallel" does not
        # actually shard a grid axis across TensorCores.
        dim_sem = (pltpu.CORE_PARALLEL, pltpu.ARBITRARY)
    else:
        dim_sem = ("arbitrary", "arbitrary")

    partials = pl.pallas_call(
        kernel,
        out_shape=jax.ShapeDtypeStruct(
            (num_slots, 3 * SUBLANES, LANES), jnp.float32),
        grid_spec=pltpu.PrefetchScalarGridSpec(
            num_scalar_prefetch=0,
            grid=(num_slots, blocks_per_slot),
            in_specs=[in_block, in_block, in_block],
            out_specs=pl.BlockSpec((1, 3 * SUBLANES, LANES),
                                   lambda s, k: (s, 0, 0)),
        ),
        compiler_params=pltpu.CompilerParams(
            dimension_semantics=dim_sem,
            vmem_limit_bytes=32 * 1024 * 1024,
        ),
    )(yp2d, yt2d, p2d)

    # Tiny epilogue: cross-lane reduce of <=2 partial tiles + scalar math.
    # TODO(synk): for latency-critical tiny inputs this could be finalized
    # in-kernel (SMEM scalar outputs) to drop this extra XLA dispatch.
    sums = jnp.sum(partials.reshape(num_slots, 3, SUBLANES, LANES),
                   axis=(0, 2, 3))
    i, j, intersection = sums[0], sums[1], sums[2]

    if tail:
        # <128-element flatten remainder: summed here instead of re-copying
        # (padding) all three inputs in HBM before the kernel.
        ti, tj, tinter = _masked_sums(y_pred.reshape(-1)[rows * LANES:],
                                      y_true.reshape(-1)[rows * LANES:],
                                      pmap.reshape(-1)[rows * LANES:])
        i, j, intersection = i + ti, j + tj, intersection + tinter

    return _dice_from_sums(i, j, intersection)


def _reference(y_pred, y_true, pmap):
    """Plain-JAX reference mirroring the PyTorch module (f32 math)."""
    y_pred = y_pred.astype(jnp.float32)
    y_true = y_true.astype(jnp.float32)
    pmap = pmap.astype(jnp.float32)
    mask = jnp.where(pmap >= 0.8, 1.0, 0.0)
    y_true_th = y_true * mask
    y_pred_th = y_pred * mask
    i = jnp.sum(y_true_th)
    j = jnp.sum(y_pred_th)
    intersection = jnp.sum(y_true_th * y_pred_th)
    score = (2.0 * intersection) / (i + j)
    return 1.0 - score


if __name__ == "__main__":
    key = jax.random.PRNGKey(0)

    def _check(shape, subkey, dtype=jnp.float32, tol=1e-5):
        k1, k2, k3 = jax.random.split(subkey, 3)
        y_pred = jax.random.uniform(k1, shape, dtype=jnp.float32).astype(dtype)
        y_true = (jax.random.uniform(k2, shape) > 0.5).astype(dtype)
        pmap = jax.random.uniform(k3, shape, dtype=jnp.float32).astype(dtype)
        got = jax.block_until_ready(pdice_loss(y_pred, y_true, pmap))
        ref = _reference(y_pred, y_true, pmap)
        assert jnp.allclose(got, ref, rtol=tol, atol=tol), (shape, dtype, got, ref)

    # Primary small NCHW case matching the module's convention.
    _check((2, 4, 16, 16), jax.random.fold_in(key, 0))
    # Unaligned size -> exercises the no-pad path (plain-JAX <128-elem tail,
    # non-multiple-of-8 full-dim block).
    _check((2, 3, 37, 41), jax.random.fold_in(key, 1))
    # Multi-block case -> exercises k-accumulation + edge-block row mask.
    _check((2, 4, 320, 320), jax.random.fold_in(key, 2))
    # Native bf16 inputs -> exercises the in-kernel upcast path (no wrapper copy).
    _check((2, 4, 160, 160), jax.random.fold_in(key, 3),
           dtype=jnp.bfloat16, tol=1e-4)

    print("KERNEL_OK")
</pallas_src>

<mosaic_0001>
module attributes {stable_mosaic.version = 11 : i64} {
  func.func @_pdice_partial_kernel(%arg0: i32, %arg1: i32, %arg2: memref<16x128xf32, #tpu.memory_space<vmem>>, %arg3: memref<16x128xf32, #tpu.memory_space<vmem>>, %arg4: memref<16x128xf32, #tpu.memory_space<vmem>>, %arg5: memref<1x24x128xf32, #tpu.memory_space<vmem>>) attributes {dimension_semantics = [#tpu.dimension_semantics<arbitrary>, #tpu.dimension_semantics<arbitrary>], iteration_bounds = array<i64: 1, 1>, scalar_prefetch = 0 : i64, scratch_operands = 0 : i64, tpu.core_type = #tpu.core_type<tc>, window_params = [{transform_indices = @transform_0, window_bounds = array<i64: 16, 128>}, {transform_indices = @transform_1, window_bounds = array<i64: 16, 128>}, {transform_indices = @transform_2, window_bounds = array<i64: 16, 128>}, {transform_indices = @transform_3, window_bounds = array<i64: 1, 24, 128>}]} {
    %c0_i32 = arith.constant 0 : i32
    %0 = arith.cmpi eq, %arg1, %c0_i32 : i32
    %1 = arith.extui %0 : i1 to i32
    %c0_i32_0 = arith.constant 0 : i32
    %2 = arith.cmpi ne, %1, %c0_i32_0 : i32
    scf.if %2 {
      %cst_27 = arith.constant 0.000000e+00 : f32
      %37 = vector.broadcast %cst_27 : f32 to vector<1x24x128xf32>
      %c0_28 = arith.constant 0 : index
      %c0_29 = arith.constant 0 : index
      %c0_30 = arith.constant 0 : index
      %38 = vector.load %arg5[%c0_28, %c0_29, %c0_30] : memref<1x24x128xf32, #tpu.memory_space<vmem>>, vector<1x24x128xf32>
      tpu.vector_store %arg5[%c0_28, %c0_29, %c0_30], %37 {strides = array<i32>} : memref<1x24x128xf32, #tpu.memory_space<vmem>>, vector<1x24x128xf32>,
    } else {
    }
    %c0 = arith.constant 0 : index
    %c0_1 = arith.constant 0 : index
    %3 = vector.load %arg4[%c0, %c0_1] : memref<16x128xf32, #tpu.memory_space<vmem>>, vector<16x128xf32>
    %cst = arith.constant 8.000000e-01 : f32
    %4 = vector.broadcast %cst : f32 to vector<16x128xf32>
    %5 = arith.cmpf oge, %3, %4 : vector<16x128xf32>
    %c0_2 = arith.constant 0 : index
    %c0_3 = arith.constant 0 : index
    %6 = vector.load %arg3[%c0_2, %c0_3] : memref<16x128xf32, #tpu.memory_space<vmem>>, vector<16x128xf32>
    %cst_4 = arith.constant 0.000000e+00 : f32
    %7 = vector.broadcast %cst_4 : f32 to vector<16x128xf32>
    %8 = arith.select %5, %6, %7 : vector<16x128xi1>, vector<16x128xf32>
    %c0_5 = arith.constant 0 : index
    %c0_6 = arith.constant 0 : index
    %9 = vector.load %arg2[%c0_5, %c0_6] : memref<16x128xf32, #tpu.memory_space<vmem>>, vector<16x128xf32>
    %cst_7 = arith.constant 0.000000e+00 : f32
    %10 = vector.broadcast %cst_7 : f32 to vector<16x128xf32>
    %11 = arith.select %5, %9, %10 : vector<16x128xi1>, vector<16x128xf32>
    %c0_8 = arith.constant 0 : index
    %c0_9 = arith.constant 0 : index
    %c0_10 = arith.constant 0 : index
    %12 = vector.load %arg5[%c0_8, %c0_9, %c0_10] : memref<1x24x128xf32, #tpu.memory_space<vmem>>, vector<1x8x128xf32>
    %13 = vector.shape_cast %12 : vector<1x8x128xf32> to vector<8x128xf32>
    %14 = vector.shape_cast %8 : vector<16x128xf32> to vector<2x8x128xf32>
    %cst_11 = arith.constant dense<0.000000e+00> : vector<8x128xf32>
    %15 = vector.multi_reduction <add>, %14, %cst_11 [0] : vector<2x8x128xf32> to vector<8x128xf32>
    %16 = arith.addf %13, %15 : vector<8x128xf32>
    %c0_12 = arith.constant 0 : index
    %c0_13 = arith.constant 0 : index
    %c0_14 = arith.constant 0 : index
    %17 = vector.load %arg5[%c0_12, %c0_13, %c0_14] : memref<1x24x128xf32, #tpu.memory_space<vmem>>, vector<1x8x128xf32>
    %18 = vector.shape_cast %17 : vector<1x8x128xf32> to vector<8x128xf32>
    %19 = vector.shape_cast %16 : vector<8x128xf32> to vector<1x8x128xf32>
    tpu.vector_store %arg5[%c0_12, %c0_13, %c0_14], %19 {strides = array<i32>} : memref<1x24x128xf32, #tpu.memory_space<vmem>>, vector<1x8x128xf32>,
    %c0_15 = arith.constant 0 : index
    %c8 = arith.constant 8 : index
    %c0_16 = arith.constant 0 : index
    %20 = vector.load %arg5[%c0_15, %c8, %c0_16] : memref<1x24x128xf32, #tpu.memory_space<vmem>>, vector<1x8x128xf32>
    %21 = vector.shape_cast %20 : vector<1x8x128xf32> to vector<8x128xf32>
    %22 = vector.shape_cast %11 : vector<16x128xf32> to vector<2x8x128xf32>
    %cst_17 = arith.constant dense<0.000000e+00> : vector<8x128xf32>
    %23 = vector.multi_reduction <add>, %22, %cst_17 [0] : vector<2x8x128xf32> to vector<8x128xf32>
    %24 = arith.addf %21, %23 : vector<8x128xf32>
    %c0_18 = arith.constant 0 : index
    %c8_19 = arith.constant 8 : index
    %c0_20 = arith.constant 0 : index
    %25 = vector.load %arg5[%c0_18, %c8_19, %c0_20] : memref<1x24x128xf32, #tpu.memory_space<vmem>>, vector<1x8x128xf32>
    %26 = vector.shape_cast %25 : vector<1x8x128xf32> to vector<8x128xf32>
    %27 = vector.shape_cast %24 : vector<8x128xf32> to vector<1x8x128xf32>
    tpu.vector_store %arg5[%c0_18, %c8_19, %c0_20], %27 {strides = array<i32>} : memref<1x24x128xf32, #tpu.memory_space<vmem>>, vector<1x8x128xf32>,
    %28 = arith.mulf %8, %11 : vector<16x128xf32>
    %c0_21 = arith.constant 0 : index
    %c16 = arith.constant 16 : index
    %c0_22 = arith.constant 0 : index
    %29 = vector.load %arg5[%c0_21, %c16, %c0_22] : memref<1x24x128xf32, #tpu.memory_space<vmem>>, vector<1x8x128xf32>
    %30 = vector.shape_cast %29 : vector<1x8x128xf32> to vector<8x128xf32>
    %31 = vector.shape_cast %28 : vector<16x128xf32> to vector<2x8x128xf32>
    %cst_23 = arith.constant dense<0.000000e+00> : vector<8x128xf32>
    %32 = vector.multi_reduction <add>, %31, %cst_23 [0] : vector<2x8x128xf32> to vector<8x128xf32>
    %33 = arith.addf %30, %32 : vector<8x128xf32>
    %c0_24 = arith.constant 0 : index
    %c16_25 = arith.constant 16 : index
    %c0_26 = arith.constant 0 : index
    %34 = vector.load %arg5[%c0_24, %c16_25, %c0_26] : memref<1x24x128xf32, #tpu.memory_space<vmem>>, vector<1x8x128xf32>
    %35 = vector.shape_cast %34 : vector<1x8x128xf32> to vector<8x128xf32>
    %36 = vector.shape_cast %33 : vector<8x128xf32> to vector<1x8x128xf32>
    tpu.vector_store %arg5[%c0_24, %c16_25, %c0_26], %36 {strides = array<i32>} : memref<1x24x128xf32, #tpu.memory_space<vmem>>, vector<1x8x128xf32>,
    return
  }
  func.func @transform_0(%arg0: i32, %arg1: i32) -> (i32, i32) {
    %c1_i32 = arith.constant 1 : i32
    %0 = arith.muli %arg0, %c1_i32 : i32
    %1 = arith.addi %0, %arg1 : i32
    %c0_i32 = arith.constant 0 : i32
    %2 = arith.minsi %1, %c0_i32 : i32
    %c0_i32_0 = arith.constant 0 : i32
    %c0_i32_1 = arith.constant 0 : i32
    return %2, %c0_i32_0 : i32, i32
  }
  func.func @transform_1(%arg0: i32, %arg1: i32) -> (i32, i32) {
    %c1_i32 = arith.constant 1 : i32
    %0 = arith.muli %arg0, %c1_i32 : i32
    %1 = arith.addi %0, %arg1 : i32
    %c0_i32 = arith.constant 0 : i32
    %2 = arith.minsi %1, %c0_i32 : i32
    %c0_i32_0 = arith.constant 0 : i32
    %c0_i32_1 = arith.constant 0 : i32
    return %2, %c0_i32_0 : i32, i32
  }
  func.func @transform_2(%arg0: i32, %arg1: i32) -> (i32, i32) {
    %c1_i32 = arith.constant 1 : i32
    %0 = arith.muli %arg0, %c1_i32 : i32
    %1 = arith.addi %0, %arg1 : i32
    %c0_i32 = arith.constant 0 : i32
    %2 = arith.minsi %1, %c0_i32 : i32
    %c0_i32_0 = arith.constant 0 : i32
    %c0_i32_1 = arith.constant 0 : i32
    return %2, %c0_i32_0 : i32, i32
  }
  func.func @transform_3(%arg0: i32, %arg1: i32) -> (i32, i32, i32) {
    %c0_i32 = arith.constant 0 : i32
    %c0_i32_0 = arith.constant 0 : i32
    %c0_i32_1 = arith.constant 0 : i32
    return %arg0, %c0_i32, %c0_i32_0 : i32, i32, i32
  }
}

</mosaic_0001>

<bundles_post_ra>
// kernel: pdice_loss.1
= control target key start
LH: loop header
LB: loop body
LE: loop exit
PB: predicated region body
PF: predicated region fallthrough
CT: control target
= control target key end

     0   :  { %s213_s1 = inlined_call_operand.vmem [shape: f32[16,128], index: 1, kind: input, shape index: {}]   ;;  %s214_s2 = inlined_call_operand.vmem [shape: f32[16,128], index: 2, kind: input, shape index: {}]   ;;  %s215_s0 = inlined_call_operand.vmem [shape: f32[16,128], index: 0, kind: input, shape index: {}]   ;;  %s216_s3 = inlined_call_operand.vmem [shape: f32[1,24,128], index: 3, kind: output, shape index: {}]  }
   0x1   :  { %v117_v0 = vld [vmem:[%s214_s2] sm:$0xff]  ;;  %v118_v1 = vld [vmem:[%s214_s2 + $0x8] sm:$0xff] }
   0x2   :  { %v121_v2 = vld [vmem:[%s213_s1] sm:$0xff]  ;;  %vm119_vm0 = vcmp.ge.f32.partialorder %v117_v0, 0.8  ;;  %vm120_vm1 = vcmp.ge.f32.partialorder %v118_v1, 0.8  ;;  %v122_v3 = vld [vmem:[%s213_s1 + $0x8] sm:$0xff] }
   0x3   :  { %v125_v4 = vld [vmem:[%s215_s0] sm:$0xff]  ;;  %v123_v5 = vsel %vm119_vm0, %v121_v2, 0.0  ;;  %v124_v6 = vsel %vm120_vm1, %v122_v3, 0.0  ;;  %v126_v7 = vld [vmem:[%s215_s0 + $0x8] sm:$0xff] }
   0x4   :  { %v127_v8 = vsel %vm119_vm0, %v125_v4, 0.0  ;;  %v130_v9 = vadd.f32 %v124_v6, %v123_v5  ;;  %v128_v10 = vsel %vm120_vm1, %v126_v7, 0.0 }
   0x5   :  { %v137_v11 = vmul.f32 %v127_v8, %v123_v5  ;;  %v134_v12 = vadd.f32 %v128_v10, %v127_v8  ;;  %v138_v13 = vmul.f32 %v128_v10, %v124_v6 }
   0x6   :  { %132 = vst [vmem:[%s216_s3] sm:$0xff] %v130_v9 }
   0x7   :  { %v140_v14 = vadd.f32 %v138_v13, %v137_v11  ;;  %136 = vst [vmem:[%s216_s3 + $0x8] sm:$0xff] %v134_v12 }
   0x9   :  { %142 = vst [vmem:[%s216_s3 + $0x10] sm:$0xff] %v140_v14 }

</bundles_post_ra>
